<compile_context>
chip_gen: v7x
topology: tpu7x:2x2x1
jax: 0.10.0
libtpu: 0.0.40
codegen_flags: <defaults>
</compile_context>

<pallas_src>
import functools

import jax
import jax.numpy as jnp
from jax.experimental import pallas as pl
from jax.experimental.pallas import tpu as pltpu


def prm_kernel(x_ref, w1t_ref, b1_ref, w2_ref, b2_ref, o_ref):
    # x_ref: (tb, D) tile, batch on the sublane axis (native input layout).
    x = x_ref[...]

    # Layer 1 (MXU): (tb, D) @ (D, H) -> (tb, H); bias + ReLU on the VPU.
    h = jnp.dot(x, w1t_ref[...], preferred_element_type=jnp.float32)
    h = jnp.maximum(h + b1_ref[...], 0.0)          # b1: (1, H) lane-dense row (splat)

    # Layer 2 (MXU, N=1): (tb, H) @ (H, 1) -> (tb, 1); scalar bias from SMEM.
    o = jnp.dot(h, w2_ref[...], preferred_element_type=jnp.float32)
    o = o + b2_ref[0]

    o_ref[...] = jax.nn.sigmoid(o).astype(o_ref.dtype)   # (tb, 1); tail rows masked


def _round_up(x, m):
    return ((x + m - 1) // m) * m


@functools.partial(jax.jit, static_argnames=("block_b",))
def prm_forward(x, w1, b1, w2, b2, *, block_b=8192):
    """PRM forward.  x: (B, input_dim) f32 -> (B, 1) f32.

    Params in PyTorch nn.Linear layout: w1 (H, D), b1 (H,), w2 (1, H), b2 (1,).
    """
    B, D = x.shape
    H = w1.shape[0]

    # Batch tile: multiple of 8 sublanes, capped at block_b; keep >= 2 grid
    # steps when B allows so the "parallel" axis can use both v7x TensorCores.
    tb = min(_round_up(max(block_b, 8), 8),
             max(_round_up(pl.cdiv(B, 2), 8), 8))
    num_tiles = pl.cdiv(B, tb)

    # One-time, tiny param relayouts (a few hundred bytes, not a traffic concern).
    w1_t = w1.T                   # (D, H): layer 1 is x @ w1_t on the MXU
    b1_row = b1.reshape(1, H)     # lane-dense hidden-bias row
    w2_col = w2.reshape(H, 1)     # column operand for the N=1 layer-2 matmul
    b2 = b2.reshape(1,)           # (1,) scalar bias, lives in SMEM (b2_ref[0])

    # Scoped-VMEM budget: the (tb, D) / (tb, 1) blocks are lane-padded to 128
    # lanes in VMEM (so ~tb*512 B per buffer each, double-buffered), plus ~1
    # tile of f32 temps for the hidden layer.  Size the limit from tb instead
    # of relying on the per-generation default; cap well under physical VMEM.
    vmem_limit = int(min(max(10 * tb * 512, 32 << 20), 96 << 20))

    out = pl.pallas_call(
        prm_kernel,
        out_shape=jax.ShapeDtypeStruct((B, 1), jnp.float32),
        grid_spec=pltpu.PrefetchScalarGridSpec(
            num_scalar_prefetch=0,
            grid=(num_tiles,),
            in_specs=[
                # x: native (B, D), tiled along the batch/sublane axis; the
                # ragged tail block is masked by Pallas (no wrapper jnp.pad).
                pl.BlockSpec((tb, D), lambda i: (i, 0)),
                # Weights / hidden bias: constant index_map -> resident in VMEM.
                pl.BlockSpec((D, H), lambda i: (0, 0)),
                pl.BlockSpec((1, H), lambda i: (0, 0)),
                pl.BlockSpec((H, 1), lambda i: (0, 0)),
                # Output-layer bias: scalar in SMEM.
                pl.BlockSpec(memory_space=pltpu.MemorySpace.SMEM),
            ],
            out_specs=pl.BlockSpec((tb, 1), lambda i: (i, 0)),
        ),
        compiler_params=pltpu.CompilerParams(
            dimension_semantics=("parallel",),   # independent batch tiles
            vmem_limit_bytes=vmem_limit,
        ),
    )(x, w1_t, b1_row, w2_col, b2)

    return out


def init_params(key, input_dim=8, hidden=16):
    """Deterministic init matching nn.Linear default (PyTorch layouts)."""
    k1, k2, k3, k4 = jax.random.split(key, 4)
    bound1 = 1.0 / jnp.sqrt(input_dim)
    bound2 = 1.0 / jnp.sqrt(hidden)
    w1 = jax.random.uniform(k1, (hidden, input_dim), jnp.float32, -bound1, bound1)
    b1 = jax.random.uniform(k2, (hidden,), jnp.float32, -bound1, bound1)
    w2 = jax.random.uniform(k3, (1, hidden), jnp.float32, -bound2, bound2)
    b2 = jax.random.uniform(k4, (1,), jnp.float32, -bound2, bound2)
    return w1, b1, w2, b2


def _reference(x, w1, b1, w2, b2):
    h = jnp.maximum(x @ w1.T + b1, 0.0)
    return jax.nn.sigmoid(h @ w2.T + b2)


if __name__ == "__main__":
    key = jax.random.PRNGKey(0)
    kx, kp, kx2 = jax.random.split(key, 3)

    batch, input_dim, hidden = 8, 8, 16
    x = jax.random.normal(kx, (batch, input_dim), jnp.float32)
    w1, b1, w2, b2 = init_params(kp, input_dim, hidden)

    # Small single-tile run.
    out = prm_forward(x, w1, b1, w2, b2)
    jax.block_until_ready(out)
    ref = _reference(x, w1, b1, w2, b2)
    assert out.shape == (batch, 1)
    assert jnp.allclose(out, ref, atol=1e-5, rtol=1e-5)

    # Multi-tile run with a ragged batch (exercises tiling + the masked tail
    # block; no wrapper-side padding or transpose).
    x2 = jax.random.normal(kx2, (300, input_dim), jnp.float32)
    out2 = prm_forward(x2, w1, b1, w2, b2, block_b=128)
    jax.block_until_ready(out2)
    ref2 = _reference(x2, w1, b1, w2, b2)
    assert out2.shape == (300, 1)
    assert jnp.allclose(out2, ref2, atol=1e-5, rtol=1e-5)

    print("KERNEL_OK")
</pallas_src>

<mosaic_0001>
module attributes {stable_mosaic.version = 11 : i64} {
  func.func @prm_kernel(%arg0: i32, %arg1: memref<8x8xf32, #tpu.memory_space<vmem>>, %arg2: memref<8x16xf32, #tpu.memory_space<vmem>>, %arg3: memref<1x16xf32, #tpu.memory_space<vmem>>, %arg4: memref<16x1xf32, #tpu.memory_space<vmem>>, %arg5: memref<1xf32, #tpu.memory_space<smem>>, %arg6: memref<8x1xf32, #tpu.memory_space<vmem>>) attributes {dimension_semantics = [#tpu.dimension_semantics<parallel>], iteration_bounds = array<i64: 1>, scalar_prefetch = 0 : i64, scratch_operands = 0 : i64, tpu.core_type = #tpu.core_type<tc>, window_params = [{transform_indices = @transform_0, window_bounds = array<i64: 8, 8>}, {pipeline_mode = #tpu.pipeline_mode<synchronous>, transform_indices = @transform_1, window_bounds = array<i64: 8, 16>}, {pipeline_mode = #tpu.pipeline_mode<synchronous>, transform_indices = @transform_2, window_bounds = array<i64: 1, 16>}, {pipeline_mode = #tpu.pipeline_mode<synchronous>, transform_indices = @transform_3, window_bounds = array<i64: 16, 1>}, {transform_indices = @transform_4, window_bounds = array<i64: 1>}, {transform_indices = @transform_5, window_bounds = array<i64: 8, 1>}]} {
    %c0 = arith.constant 0 : index
    %c0_0 = arith.constant 0 : index
    %0 = vector.load %arg1[%c0, %c0_0] : memref<8x8xf32, #tpu.memory_space<vmem>>, vector<8x8xf32>
    %c0_1 = arith.constant 0 : index
    %c0_2 = arith.constant 0 : index
    %1 = vector.load %arg2[%c0_1, %c0_2] : memref<8x16xf32, #tpu.memory_space<vmem>>, vector<8x16xf32>
    %cst = arith.constant dense<0.000000e+00> : vector<8x16xf32>
    %2 = tpu.matmul %0, %1, %cst {dimension_numbers = #tpu.dot_dimension_numbers<[1], [0], [0], [1], [0, 0, 1, 1], [], []>} : vector<8x8xf32>, vector<8x16xf32>, vector<8x16xf32> -> vector<8x16xf32>
    %c0_3 = arith.constant 0 : index
    %c0_4 = arith.constant 0 : index
    %3 = vector.load %arg3[%c0_3, %c0_4] : memref<1x16xf32, #tpu.memory_space<vmem>>, vector<1x16xf32>
    %4 = vector.broadcast %3 : vector<1x16xf32> to vector<8x16xf32>
    %5 = arith.addf %2, %4 : vector<8x16xf32>
    %cst_5 = arith.constant 0.000000e+00 : f32
    %6 = vector.broadcast %cst_5 : f32 to vector<8x16xf32>
    %7 = arith.maximumf %5, %6 : vector<8x16xf32>
    %c0_6 = arith.constant 0 : index
    %c0_7 = arith.constant 0 : index
    %8 = vector.load %arg4[%c0_6, %c0_7] : memref<16x1xf32, #tpu.memory_space<vmem>>, vector<16x1xf32>
    %cst_8 = arith.constant dense<0.000000e+00> : vector<8x1xf32>
    %9 = tpu.matmul %7, %8, %cst_8 {dimension_numbers = #tpu.dot_dimension_numbers<[1], [0], [0], [1], [0, 0, 1, 1], [], []>} : vector<8x16xf32>, vector<16x1xf32>, vector<8x1xf32> -> vector<8x1xf32>
    %c0_9 = arith.constant 0 : index
    %10 = memref.load %arg5[%c0_9] : memref<1xf32, #tpu.memory_space<smem>>
    %11 = vector.broadcast %10 : f32 to vector<8x1xf32>
    %12 = arith.addf %9, %11 : vector<8x1xf32>
    %13 = arith.negf %12 : vector<8x1xf32>
    %14 = math.exp %13 : vector<8x1xf32>
    %cst_10 = arith.constant 1.000000e+00 : f32
    %15 = vector.broadcast %cst_10 : f32 to vector<8x1xf32>
    %16 = arith.addf %15, %14 : vector<8x1xf32>
    %17 = arith.divf %15, %16 : vector<8x1xf32>
    %c0_11 = arith.constant 0 : index
    %c0_12 = arith.constant 0 : index
    %18 = vector.load %arg6[%c0_11, %c0_12] : memref<8x1xf32, #tpu.memory_space<vmem>>, vector<8x1xf32>
    tpu.vector_store %arg6[%c0_11, %c0_12], %17 {strides = array<i32>} : memref<8x1xf32, #tpu.memory_space<vmem>>, vector<8x1xf32>,
    return
  }
  func.func @transform_0(%arg0: i32) -> (i32, i32) {
    %c0_i32 = arith.constant 0 : i32
    %c0_i32_0 = arith.constant 0 : i32
    return %arg0, %c0_i32 : i32, i32
  }
  func.func @transform_1(%arg0: i32) -> (i32, i32) {
    %c0_i32 = arith.constant 0 : i32
    %c0_i32_0 = arith.constant 0 : i32
    %c0_i32_1 = arith.constant 0 : i32
    return %c0_i32, %c0_i32_0 : i32, i32
  }
  func.func @transform_2(%arg0: i32) -> (i32, i32) {
    %c0_i32 = arith.constant 0 : i32
    %c0_i32_0 = arith.constant 0 : i32
    %c0_i32_1 = arith.constant 0 : i32
    return %c0_i32, %c0_i32_0 : i32, i32
  }
  func.func @transform_3(%arg0: i32) -> (i32, i32) {
    %c0_i32 = arith.constant 0 : i32
    %c0_i32_0 = arith.constant 0 : i32
    %c0_i32_1 = arith.constant 0 : i32
    return %c0_i32, %c0_i32_0 : i32, i32
  }
  func.func @transform_4(%arg0: i32) -> i32 {
    %c0_i32 = arith.constant 0 : i32
    %c0_i32_0 = arith.constant 0 : i32
    return %c0_i32 : i32
  }
  func.func @transform_5(%arg0: i32) -> (i32, i32) {
    %c0_i32 = arith.constant 0 : i32
    %c0_i32_0 = arith.constant 0 : i32
    return %arg0, %c0_i32 : i32, i32
  }
}

</mosaic_0001>

<bundles_post_ra>
// kernel: prm_forward.1
= control target key start
LH: loop header
LB: loop body
LE: loop exit
PB: predicated region body
PF: predicated region fallthrough
CT: control target
= control target key end

     0   :  { %vm30_vm0 = vcmask 64512   ;;  %v226_v0 = vmov 0.0   ;;  %vm227_vm1 = vmmov 0   ;;  %v228_v6 = vmov 0.0|0.0   ;;  %s280_s1 = inlined_call_operand.vmem [shape: f32[8,16], index: 1, kind: input, shape index: {}]   ;;  %s281_s0 = inlined_call_operand.vmem [shape: f32[8,8], index: 0, kind: input, shape index: {}]   ;;  %s282_s3 = inlined_call_operand.vmem [shape: f32[16,1], index: 3, kind: input, shape index: {}]   ;;  %s283_s2 = inlined_call_operand.vmem [shape: f32[1,16], index: 2, kind: input, shape index: {}]   ;;  %s284_s4 = inlined_call_operand.<no memory space> [shape: f32[1], index: 4, kind: input, shape index: {}]   ;;  %s285_s5 = inlined_call_operand.vmem [shape: f32[8,1], index: 5, kind: output, shape index: {}]  }
   0x1   :  { %204 = vmatprep.subr.mxu0 %v226_v0  ;;  %v22_v1 = vld [vmem:[%s280_s1] sm:$0xff]  ;;  %206 = vmatprep.mubr.msk.f32.mxu0 %vm227_vm1, %v226_v0  ;;  %v106_v4 = vld [vmem:[%s282_s3 + $0x8] sm:$0xff]  ;;  %vm109_vm2 = vcmask 130048   ;;  %v108_v12 = vstv %s284_s4  ;;  %vm189_vm3 = vcmask 7168  }
   0x2   :  { %v21_v2 = vld [vmem:[%s281_s0] sm:$0xff]  ;;  %205 = vmatpush3.msra.mxu0 %v22_v1  ;;  %213 = vmatprep.mubr.msk.f32.mxu1 %vm227_vm1, %v226_v0 }
   0x3   :  { %207 = vmatmul.mubr.msk.f32.vlgmr.msra.gmra.mrb[0].mxu0 %vm30_vm0, %v21_v2  ;;  %v105_v3 = vld [vmem:[%s282_s3] sm:$0xff]  ;;  %216 = vmatprep.subr.bf16.mxu1 %v228_v6 }
   0x4   :  { %v217_v5 = vpack.c.bf16 %v106_v4, %v105_v3  ;;  %v195_v7 = vld [vmem:[%s283_s2] ss:$0 sm:$0xff] }
   0x6   :  { %218 = vmatpush3.bf16.msra.mxu1 %v217_v5 }
  0xd6   :  { %v100_v8 = vpop.f32.mrb[0].mxu0 }
  0xd7   :  { %v101_v9 = vadd.f32 %v195_v7, %v100_v8  ;;  %v208_v10 = vpop.f32.mrb[1].mxu0 }
  0xd9   :  { %v104_v11 = vmax.f32 %v101_v9, 0.0 }
  0xdb   :  { %214 = vmatmul.mubr.msk.f32.vlgmr.msra.gmra.mrb[0].mxu1 %vm109_vm2, %v104_v11 }
 0x1ae   :  { %v179_v13 = vpop.f32.mrb[0].mxu1 }
 0x1af   :  { %v180_v14 = vadd.f32 %v179_v13, %v108_v12  ;;  %v215_v15 = vpop.f32.mrb[1].mxu1 }
 0x1b1   :  { %v198_v16 = vmul.f32 -1.442695, %v180_v14 }
 0x1b3   :  { %222 = vpow2.f32 %v198_v16 }
 0x1bd   :  { %v223_v17 = vpop.eup %222 }
 0x1be   :  { %v186_v18 = vadd.f32 1.0, %v223_v17 }
 0x1c0   :  { %224 = vrcp.f32 %v186_v18 }
 0x1ca   :  { %v225_v19 = vpop.eup %224 }
 0x1cb   :  { %190 = vst.msk [vmem:[%s285_s5] sm:$0xff] %vm189_vm3, %v225_v19 }

</bundles_post_ra>
